<compile_context>
chip_gen: v5e
topology: v5e:2x2
jax: 0.10.0
libtpu: 0.0.40
codegen_flags: <defaults>
</compile_context>

<pallas_src>
import jax
import jax.numpy as jnp
from jax.experimental import pallas as pl
from jax.experimental.pallas import tpu as pltpu

K_IN = 28 * 28          # 784
K_PAD = 896             # 7 * 128 — lane-aligned contraction dim for fc1


def mlp_kernel(x_ref, w1_ref, b1_ref, w2_ref, b2_ref, w3_ref, b3_ref, out_ref):
    # x tile: (TM, 896) bf16; weights bf16; biases f32; out (TM, 10) f32.
    x = x_ref[...]

    # fc1 + ReLU  (bf16 MXU, f32 accumulate)
    h1 = jnp.dot(x, w1_ref[...], preferred_element_type=jnp.float32) + b1_ref[...]
    h1 = jnp.maximum(h1, 0.0).astype(jnp.bfloat16)

    # fc2 + ReLU
    h2 = jnp.dot(h1, w2_ref[...], preferred_element_type=jnp.float32) + b2_ref[...]
    h2 = jnp.maximum(h2, 0.0).astype(jnp.bfloat16)

    # fc3 (logits, f32)
    logits = jnp.dot(h2, w3_ref[...], preferred_element_type=jnp.float32) + b3_ref[...]

    # log_softmax in f32 (XLU reductions + EUP exp/log: free under fc1 MXU/DMA)
    m = jnp.max(logits, axis=-1, keepdims=True)
    shifted = logits - m
    lse = jnp.log(jnp.sum(jnp.exp(shifted), axis=-1, keepdims=True))
    out_ref[...] = (shifted - lse).astype(out_ref.dtype)


def _round_up(n, m):
    return ((n + m - 1) // m) * m


def net_forward(x, params, *, block_m=512):
    """x: (B, 784) float; params: dict of w1,b1,w2,b2,w3,b3 (pre-transposed)."""
    w1, b1, w2, b2, w3, b3 = (params[k] for k in ("w1", "b1", "w2", "b2", "w3", "b3"))
    B, K = x.shape
    assert K == K_IN

    # Batch tile: multiple of 8 (sublane), capped at block_m; pad B up to a
    # multiple of the tile (pad rows pass harmlessly through MLP + log_softmax
    # and are sliced off below — no reliance on implicit masking).
    tm = min(block_m, _round_up(B, 8))
    b_pad = _round_up(B, tm)

    # Host-side prep: pad K 784->896 and B->b_pad; stream x / weights in bf16,
    # keep biases (and all accumulation) in f32.
    x_p = jnp.pad(x, ((0, b_pad - B), (0, K_PAD - K))).astype(jnp.bfloat16)
    w1_p = jnp.pad(w1, ((0, K_PAD - K), (0, 0))).astype(jnp.bfloat16)
    w2_b = w2.astype(jnp.bfloat16)
    w3_b = w3.astype(jnp.bfloat16)
    b1_f = b1.astype(jnp.float32)
    b2_f = b2.astype(jnp.float32)
    b3_f = b3.astype(jnp.float32)

    # Resident (non-streamed) operands: full block, constant index_map.
    const = lambda shape: pl.BlockSpec(shape, lambda i, _s=shape: (0,) * len(_s))

    out = pl.pallas_call(
        mlp_kernel,
        out_shape=jax.ShapeDtypeStruct((b_pad, 10), jnp.float32),
        grid=(b_pad // tm,),
        in_specs=[
            pl.BlockSpec((tm, K_PAD), lambda i: (i, 0)),   # streamed x tile
            const(w1_p.shape), const(b1_f.shape),          # resident fc1
            const(w2_b.shape), const(b2_f.shape),          # resident fc2
            const(w3_b.shape), const(b3_f.shape),          # resident fc3
        ],
        out_specs=pl.BlockSpec((tm, 10), lambda i: (i, 0)),
        compiler_params=pltpu.CompilerParams(
            dimension_semantics=("parallel",),             # 2x on v7x dual-TC
        ),
    )(x_p, w1_p, b1_f, w2_b, b2_f, w3_b, b3_f)

    return out[:B]


def init_params(key):
    """Deterministic init matching nn.Linear (uniform +-1/sqrt(fan_in))."""
    def linear(key, fan_in, fan_out):
        kw, kb = jax.random.split(key)
        bound = 1.0 / jnp.sqrt(fan_in)
        # stored as (in, out) so the kernel does x @ W
        w = jax.random.uniform(kw, (fan_in, fan_out), jnp.float32, -bound, bound)
        b = jax.random.uniform(kb, (1, fan_out), jnp.float32, -bound, bound)
        return w, b

    k1, k2, k3 = jax.random.split(key, 3)
    w1, b1 = linear(k1, K_IN, 128)
    w2, b2 = linear(k2, 128, 64)
    w3, b3 = linear(k3, 64, 10)
    return {"w1": w1, "b1": b1, "w2": w2, "b2": b2, "w3": w3, "b3": b3}


def ref_forward(x, params):
    """Pure-JAX reference matching the kernel's bf16-storage / f32-accumulate math."""
    xb = x.astype(jnp.bfloat16)
    h1 = jnp.dot(xb, params["w1"].astype(jnp.bfloat16),
                 preferred_element_type=jnp.float32) + params["b1"]
    h1 = jnp.maximum(h1, 0.0).astype(jnp.bfloat16)
    h2 = jnp.dot(h1, params["w2"].astype(jnp.bfloat16),
                 preferred_element_type=jnp.float32) + params["b2"]
    h2 = jnp.maximum(h2, 0.0).astype(jnp.bfloat16)
    logits = jnp.dot(h2, params["w3"].astype(jnp.bfloat16),
                     preferred_element_type=jnp.float32) + params["b3"]
    return jax.nn.log_softmax(logits, axis=-1)


if __name__ == "__main__":
    key = jax.random.PRNGKey(0)
    kx, kp = jax.random.split(key)

    B = 8  # small batch for the correctness check
    # Input as MNIST-like images (B, 1, 28, 28); flatten like x.view(-1, 28*28)
    x_img = jax.random.normal(kx, (B, 1, 28, 28), jnp.float32)
    x = x_img.reshape(-1, K_IN)

    params = init_params(kp)

    out = net_forward(x, params)
    out = jax.block_until_ready(out)

    assert out.shape == (B, 10)

    # log_softmax rows should sum (in prob space) to ~1 (computed in f32)
    probs_sum = jnp.sum(jnp.exp(out), axis=-1)
    assert jnp.allclose(probs_sum, 1.0, atol=1e-4), probs_sum

    # match the pure-JAX bf16/f32 reference
    ref = ref_forward(x, params)
    assert jnp.allclose(out, ref, atol=2e-2), jnp.max(jnp.abs(out - ref))

    print("KERNEL_OK")
</pallas_src>

<mosaic_0001>
module attributes {stable_mosaic.version = 11 : i64} {
  func.func @mlp_kernel(%arg0: i32, %arg1: memref<8x896xbf16, #tpu.memory_space<vmem>>, %arg2: memref<896x128xbf16, #tpu.memory_space<vmem>>, %arg3: memref<1x128xf32, #tpu.memory_space<vmem>>, %arg4: memref<128x64xbf16, #tpu.memory_space<vmem>>, %arg5: memref<1x64xf32, #tpu.memory_space<vmem>>, %arg6: memref<64x10xbf16, #tpu.memory_space<vmem>>, %arg7: memref<1x10xf32, #tpu.memory_space<vmem>>, %arg8: memref<8x10xf32, #tpu.memory_space<vmem>>) attributes {dimension_semantics = [#tpu.dimension_semantics<parallel>], iteration_bounds = array<i64: 1>, scalar_prefetch = 0 : i64, scratch_operands = 0 : i64, tpu.core_type = #tpu.core_type<tc>, window_params = [{transform_indices = @transform_0, window_bounds = array<i64: 8, 896>}, {pipeline_mode = #tpu.pipeline_mode<synchronous>, transform_indices = @transform_1, window_bounds = array<i64: 896, 128>}, {pipeline_mode = #tpu.pipeline_mode<synchronous>, transform_indices = @transform_2, window_bounds = array<i64: 1, 128>}, {pipeline_mode = #tpu.pipeline_mode<synchronous>, transform_indices = @transform_3, window_bounds = array<i64: 128, 64>}, {pipeline_mode = #tpu.pipeline_mode<synchronous>, transform_indices = @transform_4, window_bounds = array<i64: 1, 64>}, {pipeline_mode = #tpu.pipeline_mode<synchronous>, transform_indices = @transform_5, window_bounds = array<i64: 64, 10>}, {pipeline_mode = #tpu.pipeline_mode<synchronous>, transform_indices = @transform_6, window_bounds = array<i64: 1, 10>}, {transform_indices = @transform_7, window_bounds = array<i64: 8, 10>}]} {
    %c0 = arith.constant 0 : index
    %c0_0 = arith.constant 0 : index
    %0 = vector.load %arg1[%c0, %c0_0] : memref<8x896xbf16, #tpu.memory_space<vmem>>, vector<8x896xbf16>
    %c0_1 = arith.constant 0 : index
    %c0_2 = arith.constant 0 : index
    %1 = vector.load %arg2[%c0_1, %c0_2] : memref<896x128xbf16, #tpu.memory_space<vmem>>, vector<896x128xbf16>
    %cst = arith.constant dense<0.000000e+00> : vector<8x128xf32>
    %2 = tpu.matmul %0, %1, %cst {dimension_numbers = #tpu.dot_dimension_numbers<[1], [0], [0], [1], [0, 0, 1, 1], [], []>} : vector<8x896xbf16>, vector<896x128xbf16>, vector<8x128xf32> -> vector<8x128xf32>
    %c0_3 = arith.constant 0 : index
    %c0_4 = arith.constant 0 : index
    %3 = vector.load %arg3[%c0_3, %c0_4] : memref<1x128xf32, #tpu.memory_space<vmem>>, vector<1x128xf32>
    %4 = vector.broadcast %3 : vector<1x128xf32> to vector<8x128xf32>
    %5 = arith.addf %2, %4 : vector<8x128xf32>
    %cst_5 = arith.constant 0.000000e+00 : f32
    %6 = vector.broadcast %cst_5 : f32 to vector<8x128xf32>
    %7 = arith.maximumf %5, %6 : vector<8x128xf32>
    %8 = arith.truncf %7 : vector<8x128xf32> to vector<8x128xbf16>
    %c0_6 = arith.constant 0 : index
    %c0_7 = arith.constant 0 : index
    %9 = vector.load %arg4[%c0_6, %c0_7] : memref<128x64xbf16, #tpu.memory_space<vmem>>, vector<128x64xbf16>
    %cst_8 = arith.constant dense<0.000000e+00> : vector<8x64xf32>
    %10 = tpu.matmul %8, %9, %cst_8 {dimension_numbers = #tpu.dot_dimension_numbers<[1], [0], [0], [1], [0, 0, 1, 1], [], []>} : vector<8x128xbf16>, vector<128x64xbf16>, vector<8x64xf32> -> vector<8x64xf32>
    %c0_9 = arith.constant 0 : index
    %c0_10 = arith.constant 0 : index
    %11 = vector.load %arg5[%c0_9, %c0_10] : memref<1x64xf32, #tpu.memory_space<vmem>>, vector<1x64xf32>
    %12 = vector.broadcast %11 : vector<1x64xf32> to vector<8x64xf32>
    %13 = arith.addf %10, %12 : vector<8x64xf32>
    %cst_11 = arith.constant 0.000000e+00 : f32
    %14 = vector.broadcast %cst_11 : f32 to vector<8x64xf32>
    %15 = arith.maximumf %13, %14 : vector<8x64xf32>
    %16 = arith.truncf %15 : vector<8x64xf32> to vector<8x64xbf16>
    %c0_12 = arith.constant 0 : index
    %c0_13 = arith.constant 0 : index
    %17 = vector.load %arg6[%c0_12, %c0_13] : memref<64x10xbf16, #tpu.memory_space<vmem>>, vector<64x10xbf16>
    %cst_14 = arith.constant dense<0.000000e+00> : vector<8x10xf32>
    %18 = tpu.matmul %16, %17, %cst_14 {dimension_numbers = #tpu.dot_dimension_numbers<[1], [0], [0], [1], [0, 0, 1, 1], [], []>} : vector<8x64xbf16>, vector<64x10xbf16>, vector<8x10xf32> -> vector<8x10xf32>
    %c0_15 = arith.constant 0 : index
    %c0_16 = arith.constant 0 : index
    %19 = vector.load %arg7[%c0_15, %c0_16] : memref<1x10xf32, #tpu.memory_space<vmem>>, vector<1x10xf32>
    %20 = vector.broadcast %19 : vector<1x10xf32> to vector<8x10xf32>
    %21 = arith.addf %18, %20 : vector<8x10xf32>
    %cst_17 = arith.constant dense<0xFF800000> : vector<8xf32>
    %22 = vector.multi_reduction <maximumf>, %21, %cst_17 [1] : vector<8x10xf32> to vector<8xf32>
    %23 = vector.shape_cast %22 : vector<8xf32> to vector<8x1xf32>
    %24 = vector.broadcast %23 : vector<8x1xf32> to vector<8x10xf32>
    %25 = arith.subf %21, %24 : vector<8x10xf32>
    %26 = math.exp %25 : vector<8x10xf32>
    %cst_18 = arith.constant dense<0.000000e+00> : vector<8xf32>
    %27 = vector.multi_reduction <add>, %26, %cst_18 [1] : vector<8x10xf32> to vector<8xf32>
    %28 = vector.shape_cast %27 : vector<8xf32> to vector<8x1xf32>
    %29 = math.log %28 : vector<8x1xf32>
    %30 = vector.broadcast %29 : vector<8x1xf32> to vector<8x10xf32>
    %31 = arith.subf %25, %30 : vector<8x10xf32>
    %c0_19 = arith.constant 0 : index
    %c0_20 = arith.constant 0 : index
    %32 = vector.load %arg8[%c0_19, %c0_20] : memref<8x10xf32, #tpu.memory_space<vmem>>, vector<8x10xf32>
    tpu.vector_store %arg8[%c0_19, %c0_20], %31 {strides = array<i32>} : memref<8x10xf32, #tpu.memory_space<vmem>>, vector<8x10xf32>,
    return
  }
  func.func @transform_0(%arg0: i32) -> (i32, i32) {
    %c0_i32 = arith.constant 0 : i32
    %c0_i32_0 = arith.constant 0 : i32
    return %arg0, %c0_i32 : i32, i32
  }
  func.func @transform_1(%arg0: i32) -> (i32, i32) {
    %c0_i32 = arith.constant 0 : i32
    %c0_i32_0 = arith.constant 0 : i32
    %c0_i32_1 = arith.constant 0 : i32
    return %c0_i32, %c0_i32_0 : i32, i32
  }
  func.func @transform_2(%arg0: i32) -> (i32, i32) {
    %c0_i32 = arith.constant 0 : i32
    %c0_i32_0 = arith.constant 0 : i32
    %c0_i32_1 = arith.constant 0 : i32
    return %c0_i32, %c0_i32_0 : i32, i32
  }
  func.func @transform_3(%arg0: i32) -> (i32, i32) {
    %c0_i32 = arith.constant 0 : i32
    %c0_i32_0 = arith.constant 0 : i32
    %c0_i32_1 = arith.constant 0 : i32
    return %c0_i32, %c0_i32_0 : i32, i32
  }
  func.func @transform_4(%arg0: i32) -> (i32, i32) {
    %c0_i32 = arith.constant 0 : i32
    %c0_i32_0 = arith.constant 0 : i32
    %c0_i32_1 = arith.constant 0 : i32
    return %c0_i32, %c0_i32_0 : i32, i32
  }
  func.func @transform_5(%arg0: i32) -> (i32, i32) {
    %c0_i32 = arith.constant 0 : i32
    %c0_i32_0 = arith.constant 0 : i32
    %c0_i32_1 = arith.constant 0 : i32
    return %c0_i32, %c0_i32_0 : i32, i32
  }
  func.func @transform_6(%arg0: i32) -> (i32, i32) {
    %c0_i32 = arith.constant 0 : i32
    %c0_i32_0 = arith.constant 0 : i32
    %c0_i32_1 = arith.constant 0 : i32
    return %c0_i32, %c0_i32_0 : i32, i32
  }
  func.func @transform_7(%arg0: i32) -> (i32, i32) {
    %c0_i32 = arith.constant 0 : i32
    %c0_i32_0 = arith.constant 0 : i32
    return %arg0, %c0_i32 : i32, i32
  }
}

</mosaic_0001>

<bundles_post_ra>
// kernel: tpu_custom_call.1
= control target key start
LH: loop header
LB: loop body
LE: loop exit
PB: predicated region body
PF: predicated region fallthrough
CT: control target
= control target key end

     0   :  { %12 = vsyncpa [#allocation3], 0  ;;  %s1299_s0 = inlined_call_operand.vmem [shape: bf16[8,896], index: 0, kind: input, shape index: {}]   ;;  %s1300_s1 = inlined_call_operand.hbm [shape: bf16[896,128], index: 1, kind: input, shape index: {}]   ;;  %s1301_s2 = inlined_call_operand.vmem [shape: f32[1,128], index: 2, kind: input, shape index: {}]   ;;  %s1302_s3 = inlined_call_operand.vmem [shape: bf16[128,64], index: 3, kind: input, shape index: {}]   ;;  %s1303_s4 = inlined_call_operand.vmem [shape: f32[1,64], index: 4, kind: input, shape index: {}]   ;;  %s1304_s5 = inlined_call_operand.vmem [shape: bf16[64,10], index: 5, kind: input, shape index: {}]   ;;  %s1305_s6 = inlined_call_operand.vmem [shape: f32[1,10], index: 6, kind: input, shape index: {}]   ;;  %s1306_s7 = inlined_call_operand.hbm [shape: f32[8,10], index: 7, kind: output, shape index: {}]  }
   0x1   :  { %13 = vsyncpa [#allocation4], 0  ;;  %s20_s26 = sshll.u32 %s1300_s1, 4  ;;  %s1189_s27 = smov [#allocation2]   ;;  %s21_s26 = int_to_ptr.hbm [resolvable:$true] %s20_s26 }
   0x2   :  { %s22_s28 = sshll.u32 %s1189_s27, 4  ;;  %s1190_s29 = smov 64   ;;  %s23_s28 = int_to_ptr.vmem [resolvable:$true] %s22_s28 }
   0x3   :  { %s1191_s30 = smov 4  }
   0x4   :  { %28 = dma.hbm_to_vmem [thread:$0]  %s21_s26, 7168, %s23_s28, [#allocation3], %s1190_s29, %s1190_s29, %s1191_s30  }
   0x5   :  { %1185 = dma.done.wait [#allocation3], 7168  }
   0x6   :  { %1186 = vsyncadd [#allocation3], 4294960128  ;;  %v1065_v0 = vld [vmem:[#allocation2 + $0x38] sm:$0xff]  ;;  %v1064_v3 = vld [vmem:[#allocation2 + $0x30] sm:$0xff]  ;;  %vm737_vm0 = vcmask 523264   ;;  %vm754_vm1 = vcmask 80896  }
   0x7   :  { %v1073_v1 = vld [vmem:[#allocation2 + $0x78] sm:$0xff]  ;;  %525 = vmatpush.bf16.msra.mxu0 %v1065_v0  ;;  %v1072_v4 = vld [vmem:[#allocation2 + $0x70] sm:$0xff]  ;;  %v1063_v7 = vld [vmem:[#allocation2 + $0x28] sm:$0xff]  ;;  %s775_s18 = sshll.u32 %s1306_s7, 4  ;;  %s776_s18 = int_to_ptr.hbm [resolvable:$true] %s775_s18 }
   0x8   :  { %v1081_v2 = vld [vmem:[#allocation2 + $0xb8] sm:$0xff]  ;;  %538 = vmatpush.bf16.msra.mxu1 %v1073_v1  ;;  %v1080_v5 = vld [vmem:[#allocation2 + $0xb0] sm:$0xff]  ;;  %v1071_v8 = vld [vmem:[#allocation2 + $0x68] sm:$0xff] }
   0x9   :  { %551 = vmatpush.bf16.msra.mxu2 %v1081_v2  ;;  %v1089_v6 = vld [vmem:[#allocation2 + $0xf8] sm:$0xff]  ;;  %v1079_v9 = vld [vmem:[#allocation2 + $0xa8] sm:$0xff]  ;;  %v1088_v10 = vld [vmem:[#allocation2 + $0xf0] sm:$0xff] }
   0xa   :  { %564 = vmatpush.bf16.msra.mxu3 %v1089_v6  ;;  %v1062_v11 = vld [vmem:[#allocation2 + $0x20] sm:$0xff]  ;;  %v1087_v14 = vld [vmem:[#allocation2 + $0xe8] sm:$0xff]  ;;  %v1061_v15 = vld [vmem:[#allocation2 + $0x18] sm:$0xff] }
   0xb   :  { %526 = vmatpush.bf16.msra.mxu0 %v1064_v3  ;;  %v1070_v12 = vld [vmem:[#allocation2 + $0x60] sm:$0xff]  ;;  %v1069_v16 = vld [vmem:[#allocation2 + $0x58] sm:$0xff]  ;;  %v1060_v19 = vld [vmem:[#allocation2 + $0x10] sm:$0xff] }
   0xc   :  { %539 = vmatpush.bf16.msra.mxu1 %v1072_v4  ;;  %v1078_v13 = vld [vmem:[#allocation2 + $0xa0] sm:$0xff]  ;;  %v1077_v17 = vld [vmem:[#allocation2 + $0x98] sm:$0xff]  ;;  %v1068_v20 = vld [vmem:[#allocation2 + $0x50] sm:$0xff] }
   0xd   :  { %552 = vmatpush.bf16.msra.mxu2 %v1080_v5  ;;  %v1086_v18 = vld [vmem:[#allocation2 + $0xe0] sm:$0xff]  ;;  %v1076_v21 = vld [vmem:[#allocation2 + $0x90] sm:$0xff]  ;;  %v1085_v22 = vld [vmem:[#allocation2 + $0xd8] sm:$0xff] }
   0xe   :  { %565 = vmatpush.bf16.msra.mxu3 %v1088_v10  ;;  %v1059_v23 = vld [vmem:[#allocation2 + $0x8] sm:$0xff]  ;;  %v44_v25 = vld [vmem:[%s1299_s0] sm:$0xff]  ;;  %v1084_v27 = vld [vmem:[#allocation2 + $0xd0] sm:$0xff] }
   0xf   :  { %527 = vmatpush.bf16.msra.mxu0 %v1063_v7  ;;  %v1067_v24 = vld [vmem:[#allocation2 + $0x48] sm:$0xff]  ;;  %v168_v29 = vunpack.c.l.b16 %v44_v25  ;;  %v1058_v30 = vld [vmem:[#allocation2] sm:$0xff]  ;;  %v169_v33 = vunpack.c.h.b16 %v44_v25  ;;  %v1097_v35 = vld [vmem:[#allocation2 + $0x138] sm:$0xff] }
  0x10   :  { %540 = vmatpush.bf16.msra.mxu1 %v1071_v8  ;;  %v1075_v26 = vld [vmem:[#allocation2 + $0x88] sm:$0xff]  ;;  %v1066_v31 = vld [vmem:[#allocation2 + $0x40] sm:$0xff]  ;;  %v1105_v36 = vld [vmem:[#allocation2 + $0x178] sm:$0xff] }
  0x11   :  { %553 = vmatpush.bf16.msra.mxu2 %v1079_v9  ;;  %v45_v28 = vld [vmem:[%s1299_s0 + $0x8] sm:$0xff]  ;;  %v1074_v34 = vld [vmem:[#allocation2 + $0x80] sm:$0xff]  ;;  %v1113_v37 = vld [vmem:[#allocation2 + $0x1b8] sm:$0xff]  ;;  %v175_v38 = vpack.c.b16 %v168_v29, %v168_v29  ;;  %v176_v41 = vpack.c.b16 %v169_v33, %v169_v33 }
  0x12   :  { %566 = vmatpush.bf16.msra.mxu3 %v1087_v14  ;;  %v170_v32 = vunpack.c.l.b16 %v45_v28  ;;  %v1083_v39 = vld [vmem:[#allocation2 + $0xc8] sm:$0xff]  ;;  %v1096_v42 = vld [vmem:[#allocation2 + $0x130] sm:$0xff]  ;;  %v1082_v45 = vld [vmem:[#allocation2 + $0xc0] sm:$0xff]  ;;  %v171_v46 = vunpack.c.h.b16 %v45_v28 }
  0x13   :  { %528 = vmatpush.bf16.msra.mxu0 %v1062_v11  ;;  %v1104_v43 = vld [vmem:[#allocation2 + $0x170] sm:$0xff]  ;;  %v1095_v47 = vld [vmem:[#allocation2 + $0x128] sm:$0xff]  ;;  %v1094_v51 = vld [vmem:[#allocation2 + $0x120] sm:$0xff] }
  0x14   :  { %541 = vmatpush.bf16.msra.mxu1 %v1070_v12  ;;  %v177_v40 = vpack.c.b16 %v170_v32, %v170_v32  ;;  %v1112_v44 = vld [vmem:[#allocation2 + $0x1b0] sm:$0xff]  ;;  %v1103_v48 = vld [vmem:[#allocation2 + $0x168] sm:$0xff]  ;;  %v178_v50 = vpack.c.b16 %v171_v46, %v171_v46  ;;  %v1102_v52 = vld [vmem:[#allocation2 + $0x160] sm:$0xff] }
  0x15   :  { %554 = vmatpush.bf16.msra.mxu2 %v1078_v13  ;;  %v1111_v49 = vld [vmem:[#allocation2 + $0x1a8] sm:$0xff]  ;;  %v1110_v53 = vld [vmem:[#allocation2 + $0x1a0] sm:$0xff]  ;;  %v1093_v54 = vld [vmem:[#allocation2 + $0x118] sm:$0xff] }
  0x16   :  { %567 = vmatpush.bf16.msra.mxu3 %v1086_v18  ;;  %v1101_v55 = vld [vmem:[#allocation2 + $0x158] sm:$0xff]  ;;  %v1092_v57 = vld [vmem:[#allocation2 + $0x110] sm:$0xff]  ;;  %v1091_v60 = vld [vmem:[#allocation2 + $0x108] sm:$0xff] }
  0x17   :  { %529 = vmatpush.bf16.msra.mxu0 %v1061_v15  ;;  %v1109_v56 = vld [vmem:[#allocation2 + $0x198] sm:$0xff]  ;;  %v1100_v58 = vld [vmem:[#allocation2 + $0x150] sm:$0xff]  ;;  %v1099_v62 = vld [vmem:[#allocation2 + $0x148] sm:$0xff] }
  0x18   :  { %542 = vmatpush.bf16.msra.mxu1 %v1069_v16  ;;  %v1108_v59 = vld [vmem:[#allocation2 + $0x190] sm:$0xff]  ;;  %v1107_v63 = vld [vmem:[#allocation2 + $0x188] sm:$0xff]  ;;  %v47_v0 = vld [vmem:[%s1299_s0 + $0x18] sm:$0xf] }
  0x19   :  { %555 = vmatpush.bf16.msra.mxu2 %v1077_v17  ;;  %v46_v61 = vld [vmem:[%s1299_s0 + $0x10] sm:$0xff]  ;;  %v1090_v2 = vld [vmem:[#allocation2 + $0x100] sm:$0xff]  ;;  %v174_v4 = vunpack.c.l.b16 %v47_v0  ;;  %v1121_v10 = vld [vmem:[%s1302_s3 + $0x38] sm:$0xff] }
  0x1a   :  { %568 = vmatpush.bf16.msra.mxu3 %v1085_v22  ;;  %v172_v1 = vunpack.c.l.b16 %v46_v61  ;;  %v173_v3 = vunpack.c.h.b16 %v46_v61  ;;  %v1098_v5 = vld [vmem:[#allocation2 + $0x140] sm:$0xff]  ;;  %v1120_v11 = vld [vmem:[%s1302_s3 + $0x30] sm:$0xff]  ;;  %v1119_v12 = vld [vmem:[%s1302_s3 + $0x28] sm:$0xff] }
  0x1b   :  { %530 = vmatpush.bf16.msra.mxu0 %v1060_v19  ;;  %v1106_v6 = vld [vmem:[#allocation2 + $0x180] sm:$0xff]  ;;  %v181_v9 = vpack.c.b16 %v174_v4, %v174_v4  ;;  %v1117_v14 = vld [vmem:[%s1302_s3 + $0x18] sm:$0xff]  ;;  %v1116_v15 = vld [vmem:[%s1302_s3 + $0x10] sm:$0xff] }
  0x1c   :  { %543 = vmatpush.bf16.msra.mxu1 %v1068_v20  ;;  %v179_v7 = vpack.c.b16 %v172_v1, %v172_v1  ;;  %v180_v8 = vpack.c.b16 %v173_v3, %v173_v3  ;;  %v1118_v13 = vld [vmem:[%s1302_s3 + $0x20] sm:$0xff]  ;;  %v1115_v18 = vld [vmem:[%s1302_s3 + $0x8] sm:$0xff] }
  0x1d   :  { %556 = vmatpush.bf16.msra.mxu2 %v1076_v21  ;;  %v1114_v19 = vld [vmem:[%s1302_s3] sm:$0xff]  ;;  %v1123_v29 = vld [vmem:[%s1304_s5 + $0x8] sm:$0xff] }
  0x1e   :  { %569 = vmatpush.bf16.msra.mxu3 %v1084_v27  ;;  %v1131_v46 = vld [vmem:[%s1303_s4] ss:$0 sm:$0xff]  ;;  %s1192_s4 = smov [#allocation5]  }
  0x1f   :  { %531 = vmatpush.bf16.msra.mxu0 %v1059_v23  ;;  %v1125_v23 = vld [vmem:[%s1304_s5 + $0x18] sm:$0xff] }
  0x20   :  { %544 = vmatpush.bf16.msra.mxu1 %v1067_v24  ;;  %v1130_v24 = vld [vmem:[%s1301_s2] ss:$0 sm:$0xff] }
  0x21   :  { %557 = vmatpush.bf16.msra.mxu2 %v1075_v26  ;;  %v1124_v26 = vld [vmem:[%s1304_s5 + $0x10] sm:$0xff] }
  0x22   :  { %570 = vmatpush.bf16.msra.mxu3 %v1083_v39 }
  0x23   :  { %532 = vmatpush.bf16.msra.mxu0 %v1058_v30 }
  0x24   :  { %545 = vmatpush.bf16.msra.mxu1 %v1066_v31 }
  0x25   :  { %558 = vmatpush.bf16.msra.mxu2 %v1074_v34 }
  0x26   :  { %533 = vmatmul.bf16.vlgmr.msra.gmra.mxu0 %v175_v38  ;;  %571 = vmatpush.bf16.msra.mxu3 %v1082_v45  ;;  %v1122_v45 = vld [vmem:[%s1304_s5] sm:$0xff]  ;;  %s773_s5 = sshll.u32 %s1192_s4, 4  ;;  %s774_s5 = int_to_ptr.vmem [resolvable:$true] %s773_s5 }
  0x27   :  { %577 = vmatpush.bf16.msrb.mxu0 %v1097_v35  ;;  %546 = vmatmul.bf16.vlgmr.msra.gmra.mxu1 %v176_v41 }
  0x28   :  { %590 = vmatpush.bf16.msrb.mxu1 %v1105_v36  ;;  %559 = vmatmul.bf16.vlgmr.msra.gmra.mxu2 %v177_v40 }
  0x29   :  { %603 = vmatpush.bf16.msrb.mxu2 %v1113_v37  ;;  %572 = vmatmul.bf16.vlgmr.msra.gmra.mxu3 %v178_v50 }
  0x2a   :  { %686 = vmatpush.bf16.msrb.mxu3 %v1121_v10 }
  0x2b   :  { %578 = vmatpush.bf16.msrb.mxu0 %v1096_v42 }
  0x2c   :  { %591 = vmatpush.bf16.msrb.mxu1 %v1104_v43 }
  0x2d   :  { %604 = vmatpush.bf16.msrb.mxu2 %v1112_v44 }
  0x2e   :  { %687 = vmatpush.bf16.msrb.mxu3 %v1120_v11 }
  0x2f   :  { %579 = vmatpush.bf16.msrb.mxu0 %v1095_v47 }
  0x30   :  { %592 = vmatpush.bf16.msrb.mxu1 %v1103_v48 }
  0x31   :  { %605 = vmatpush.bf16.msrb.mxu2 %v1111_v49 }
  0x32   :  { %688 = vmatpush.bf16.msrb.mxu3 %v1119_v12 }
  0x33   :  { %580 = vmatpush.bf16.msrb.mxu0 %v1094_v51 }
  0x34   :  { %593 = vmatpush.bf16.msrb.mxu1 %v1102_v52  ;;  %v1132_v52 = vld [vmem:[%s1305_s6] ss:$0 sm:$0xff] }
  0x35   :  { %606 = vmatpush.bf16.msrb.mxu2 %v1110_v53 }
  0x36   :  { %689 = vmatpush.bf16.msrb.mxu3 %v1118_v13 }
  0x37   :  { %581 = vmatpush.bf16.msrb.mxu0 %v1093_v54 }
  0x38   :  { %594 = vmatpush.bf16.msrb.mxu1 %v1101_v55 }
  0x39   :  { %607 = vmatpush.bf16.msrb.mxu2 %v1109_v56 }
  0x3a   :  { %690 = vmatpush.bf16.msrb.mxu3 %v1117_v14 }
  0x3b   :  { %582 = vmatpush.bf16.msrb.mxu0 %v1092_v57 }
  0x3c   :  { %595 = vmatpush.bf16.msrb.mxu1 %v1100_v58 }
  0x3d   :  { %608 = vmatpush.bf16.msrb.mxu2 %v1108_v59 }
  0x3e   :  { %691 = vmatpush.bf16.msrb.mxu3 %v1116_v15 }
  0x3f   :  { %583 = vmatpush.bf16.msrb.mxu0 %v1091_v60 }
  0x40   :  { %596 = vmatpush.bf16.msrb.mxu1 %v1099_v62 }
  0x41   :  { %609 = vmatpush.bf16.msrb.mxu2 %v1107_v63 }
  0x42   :  { %692 = vmatpush.bf16.msrb.mxu3 %v1115_v18 }
  0x43   :  { %584 = vmatpush.bf16.msrb.mxu0 %v1090_v2 }
  0x44   :  { %597 = vmatpush.bf16.msrb.mxu1 %v1098_v5 }
  0x45   :  { %610 = vmatpush.bf16.msrb.mxu2 %v1106_v6 }
  0x46   :  { %585 = vmatmul.bf16.vlgmr.msrb.gmra.mxu0 %v179_v7  ;;  %693 = vmatpush.bf16.msrb.mxu3 %v1114_v19 }
  0x47   :  { %598 = vmatmul.bf16.vlgmr.msrb.gmra.mxu1 %v180_v8  ;;  %745 = vmatpush.bf16.msra.mxu0 %v1125_v23 }
  0x48   :  { %611 = vmatmul.bf16.vlgmr.msrb.gmra.mxu2 %v181_v9 }
  0x4b   :  { %746 = vmatpush.bf16.msra.mxu0 %v1124_v26 }
  0x4f   :  { %747 = vmatpush.bf16.msra.mxu0 %v1123_v29 }
  0x53   :  { %748 = vmatpush.bf16.msra.mxu0 %v1122_v45 }
  0xa3   :  { %v534_v16 = vpop.f32.mrf.mxu0 }
  0xa4   :  { %v547_v17 = vpop.f32.mrf.mxu1  ;;  %v535_v28 = vadd.f32 %v1130_v24, %v534_v16 }
  0xa6   :  { %v548_v30 = vadd.f32 %v547_v17, %v535_v28 }
  0xab   :  { %v560_v20 = vpop.f32.mrf.mxu2  ;;  %v536_v21 = vpop.f32.mrf.mxu0 }
  0xac   :  { %v549_v22 = vpop.f32.mrf.mxu1  ;;  %v573_v25 = vpop.f32.mrf.mxu3  ;;  %v561_v32 = vadd.f32 %v560_v20, %v548_v30 }
  0xae   :  { %v574_v33 = vadd.f32 %v573_v25, %v561_v32 }
  0xb3   :  { %v562_v27 = vpop.f32.mrf.mxu2 }
  0xb4   :  { %v575_v31 = vpop.f32.mrf.mxu3 }
  0xc3   :  { %v586_v34 = vpop.f32.mrf.mxu0 }
  0xc4   :  { %v599_v35 = vpop.f32.mrf.mxu1  ;;  %v587_v36 = vadd.f32 %v586_v34, %v574_v33 }
  0xc6   :  { %v600_v37 = vadd.f32 %v599_v35, %v587_v36 }
  0xcb   :  { %v612_v38 = vpop.f32.mrf.mxu2  ;;  %v588_v40 = vpop.f32.mrf.mxu0 }
  0xcc   :  { %v613_v39 = vadd.f32 %v612_v38, %v600_v37  ;;  %v601_v41 = vpop.f32.mrf.mxu1 }
  0xce   :  { %v616_v42 = vmax.f32 %v613_v39, 0.0 }
  0xd0   :  { %v617_v43 = vpack.c.bf16 %v616_v42, %v616_v42 }
  0xd2   :  { %694 = vmatmul.bf16.vlgmr.msrb.gmra.mxu3 %v617_v43 }
  0xd3   :  { %v614_v44 = vpop.f32.mrf.mxu2 }
 0x155   :  { %v695_v47 = vpop.f32.mrf.mxu3 }
 0x156   :  { %v696_v48 = vadd.f32 %v1131_v46, %v695_v47 }
 0x158   :  { %v699_v49 = vmax.f32 %v696_v48, 0.0 }
 0x15a   :  { %v700_v50 = vpack.c.bf16 %v699_v49, %v699_v49 }
 0x15c   :  { %1057 = vmatmul.msk.bf16.vlgmr.msra.gmra.mxu0 %vm737_vm0, %v700_v50 }
 0x15d   :  { %v697_v51 = vpop.f32.mrf.mxu3 }
 0x1d9   :  { %v750_v53 = vpop.f32.mrf.mxu0 }
 0x1da   :  { %v751_v54 = vadd.f32 %v1132_v52, %v750_v53 }
 0x1dc   :  { %v755_v55 = vsel %vm754_vm1, %v751_v54, -inf }
 0x1dd   :  { %756 = vmax.xlane.f32.xlu0 %v755_v55 }
 0x1e1   :  { %v752_v56 = vpop.f32.mrf.mxu0 }
 0x250   :  { %v757_v57 = vpop.xlane.xlu0 %756 }
 0x251   :  { %v758_v58 = vsub.f32 %v751_v54, %v757_v57 }
 0x253   :  { %v759_v59 = vmul.f32 1.442695, %v758_v58 }
 0x255   :  { %1133 = vpow2.f32 %v759_v59 }
 0x25b   :  { %v1134_v60 = vpop.eup %1133 }
 0x25c   :  { %v761_v61 = vsel %vm754_vm1, %v1134_v60, 0.0 }
 0x25d   :  { %762 = vadd.xlane.f32.xlu0 %v761_v61 }
 0x2d0   :  { %v763_v62 = vpop.xlane.xlu0 %762 }
 0x2d1   :  { %1135 = vlog2.f32 %v763_v62 }
 0x2d7   :  { %v1136_v63 = vpop.eup %1135 }
 0x2d8   :  { %v765_v0 = vmul.f32 0.6931472, %v1136_v63 }
 0x2da   :  { %v766_v1 = vsub.f32 %v758_v58, %v765_v0 }
 0x2dc   :  { %767 = vst.msk [vmem:[#allocation5] sm:$0xff] %vm754_vm1, %v766_v1 }
 0x2dd   :  { %778 = dma.vmem_to_hbm [thread:$0]  %s774_s5, 128, %s776_s18, [#allocation4]  }
 0x2de   :  { %1187 = dma.done.wait [#allocation4], 128  }
 0x2df   :  { %1188 = vsyncadd [#allocation4], 4294967168 }
 0x2e0   :  { %783 = vsyncpa [#allocation3], 1 }
 0x2e1   :  { %784 = vsyncpa [#allocation4], 1 }

</bundles_post_ra>
